<compile_context>
chip_gen: v5e
topology: v5e:2x2
jax: 0.10.0
libtpu: 0.0.40
codegen_flags: <defaults>
</compile_context>

<pallas_src>
import jax
import jax.numpy as jnp
from jax import lax
from jax.experimental import pallas as pl
from jax.experimental.pallas import tpu as pltpu

_NEG = -1e30  # stand-in for -inf so removed (self-loop) edges never win the max


def _edgeconv_kernel(ci_ref, ni_ref, x_ref, w_ref, b_ref, o_ref):
    """Per-batch EdgeConv: out[c, n] = max_k relu(yc[c, ci[k,n]] + yn[c, ni[k,n]] + b[c])."""
    c_out = o_ref.shape[1]
    n = o_ref.shape[2]

    x = x_ref[0]        # (C_in, N)       node features, channels-first
    w = w_ref[...]      # (2*C_out, C_in) = [Wc ; Wn]  (BN + weight-split folded on host)
    bias = b_ref[...]   # (C_out, 1)
    ci = ci_ref[0]      # (K, N) int32    center indices   (edge_index[1], transposed)
    ni = ni_ref[0]      # (K, N) int32    neighbor indices (edge_index[0], transposed)
    k_edges = ci.shape[0]

    # single node-level matmul for both terms: y = [Wc ; Wn] @ x  -> (2*C_out, N)
    y = jnp.dot(w, x, preferred_element_type=jnp.float32)
    yc = y[:c_out, :]   # center-term features   (C_out, N)
    yn = y[c_out:, :]   # neighbor-term features (C_out, N)

    row_iota = lax.broadcasted_iota(jnp.int32, (n, n), 0)   # [m, q] = m

    acc = jnp.full((c_out, n), _NEG, dtype=jnp.float32)
    for k in range(k_edges):                                 # K is small & static -> unrolled
        ci_k = ci[k:k + 1, :]                                # (1, N)
        ni_k = ni[k:k + 1, :]                                # (1, N)
        # in-VMEM gather expressed as one-hot matmuls: G[m, q] = 1 iff m == idx[q]
        g_c = jnp.dot(yc, (row_iota == ci_k).astype(jnp.float32),
                      preferred_element_type=jnp.float32)    # (C_out, N)
        g_n = jnp.dot(yn, (row_iota == ni_k).astype(jnp.float32),
                      preferred_element_type=jnp.float32)    # (C_out, N)
        e = jnp.maximum(g_c + g_n + bias, 0.0)               # conv + folded-BN + relu
        e = jnp.where(ni_k == ci_k, _NEG, e)                 # remove_self_loops
        acc = jnp.maximum(acc, e)

    o_ref[0] = acc.astype(o_ref.dtype)


def edge_conv2d(x, x_0, edge_index, conv_w, conv_b,
                bn_gamma, bn_beta, bn_mean, bn_var, *, eps=1e-5):
    """x: (B, C_in, N, 1); edge_index: (2, B, N, K) int32 ([0]=neighbor, [1]=center);
    conv_w: (C_out, 2*C_in); conv_b/bn_*: (C_out,).  Returns (B, C_out, N, 1)."""
    del x_0  # the PyTorch forward never uses x_0
    B, C_in, N, _ = x.shape
    C_out = conv_w.shape[0]
    K = edge_index.shape[-1]

    # ---- host-side folding: BN (inference) + the [x_i | x_j - x_i] weight split ----
    s = bn_gamma / jnp.sqrt(bn_var + eps)                    # (C_out,)
    w_eff = conv_w * s[:, None]                              # (C_out, 2*C_in)
    b_eff = s * (conv_b - bn_mean) + bn_beta                 # (C_out,)
    w_center = w_eff[:, :C_in] - w_eff[:, C_in:]             # applies to x_i
    w_nbr = w_eff[:, C_in:]                                  # applies to x_j
    w_cat = jnp.concatenate([w_center, w_nbr], axis=0).astype(jnp.float32)  # (2*C_out, C_in)
    bias2d = b_eff.reshape(C_out, 1).astype(jnp.float32)

    # ---- channels-first end-to-end: no activation transposes ----
    x_cn = x[..., 0].astype(jnp.float32)                     # (B, C_in, N)
    ci = jnp.transpose(edge_index[1], (0, 2, 1)).astype(jnp.int32)   # (B, K, N)
    ni = jnp.transpose(edge_index[0], (0, 2, 1)).astype(jnp.int32)   # (B, K, N)

    out = pl.pallas_call(
        _edgeconv_kernel,
        out_shape=jax.ShapeDtypeStruct((B, C_out, N), jnp.float32),
        grid_spec=pltpu.PrefetchScalarGridSpec(
            num_scalar_prefetch=0,
            grid=(B,),
            in_specs=[
                pl.BlockSpec((1, K, N), lambda b: (b, 0, 0)),        # center idx
                pl.BlockSpec((1, K, N), lambda b: (b, 0, 0)),        # neighbor idx
                pl.BlockSpec((1, C_in, N), lambda b: (b, 0, 0)),     # node features
                pl.BlockSpec((2 * C_out, C_in), lambda b: (0, 0)),   # folded weights
                pl.BlockSpec((C_out, 1), lambda b: (0, 0)),          # folded bias
            ],
            out_specs=pl.BlockSpec((1, C_out, N), lambda b: (b, 0, 0)),
        ),
        compiler_params=pltpu.CompilerParams(
            dimension_semantics=("parallel",),
            vmem_limit_bytes=32 * 1024 * 1024,
        ),
    )(ci, ni, x_cn, w_cat, bias2d)

    return out[..., None]                                    # (B, C_out, N, 1), like the module


def _reference(x, edge_index, conv_w, conv_b, gamma, beta, mean, var, eps):
    """Pure-JAX transcription of the PyTorch forward (inference-mode BatchNorm)."""
    ci = edge_index[1]                                       # (B, N, K) center
    ni = edge_index[0]                                       # (B, N, K) neighbor
    xs = x[..., 0]                                           # (B, C_in, N)
    x_i = jnp.take_along_axis(xs[:, :, None, :], ci[:, None, :, :], axis=-1)   # (B,C,N,K)
    x_j = jnp.take_along_axis(xs[:, :, None, :], ni[:, None, :, :], axis=-1)   # (B,C,N,K)
    feat = jnp.concatenate([x_i, x_j - x_i], axis=1)          # (B, 2C, N, K)
    z = jnp.einsum('oc,bcnk->bonk', conv_w, feat) + conv_b.reshape(1, -1, 1, 1)
    s = gamma / jnp.sqrt(var + eps)
    z = s.reshape(1, -1, 1, 1) * (z - mean.reshape(1, -1, 1, 1)) + beta.reshape(1, -1, 1, 1)
    z = jax.nn.relu(z)
    z = jnp.where((ni == ci)[:, None, :, :], _NEG, z)         # remove_self_loops
    return z.max(axis=-1, keepdims=True)                      # (B, C_out, N, 1)


if __name__ == "__main__":
    key = jax.random.PRNGKey(0)
    B, C_in, C_out, N, K = 2, 32, 48, 16, 8
    eps = 1e-5

    keys = jax.random.split(key, 10)
    x = jax.random.normal(keys[0], (B, C_in, N, 1), dtype=jnp.float32)
    x_0 = jax.random.normal(keys[1], (B, C_in, N, 1), dtype=jnp.float32)   # unused by forward
    nn_idx = jax.random.randint(keys[2], (B, N, K), 0, N, dtype=jnp.int32)
    center = jnp.broadcast_to(jnp.arange(N, dtype=jnp.int32)[None, :, None], (B, N, K))
    edge_index = jnp.stack([nn_idx, center], axis=0)          # (2, B, N, K)

    # deterministic parameters (Conv2d(2*C_in, C_out, 1, bias=True) + BatchNorm2d(C_out))
    bound = 1.0 / ((2 * C_in) ** 0.5)
    conv_w = jax.random.uniform(keys[3], (C_out, 2 * C_in), minval=-bound, maxval=bound,
                                dtype=jnp.float32)
    conv_b = jax.random.uniform(keys[4], (C_out,), minval=-bound, maxval=bound,
                                dtype=jnp.float32)
    bn_gamma = jax.random.uniform(keys[5], (C_out,), minval=0.5, maxval=1.5, dtype=jnp.float32)
    bn_beta = jax.random.uniform(keys[6], (C_out,), minval=-0.1, maxval=0.1, dtype=jnp.float32)
    bn_mean = 0.1 * jax.random.normal(keys[7], (C_out,), dtype=jnp.float32)
    bn_var = jax.random.uniform(keys[8], (C_out,), minval=0.5, maxval=1.5, dtype=jnp.float32)

    out = edge_conv2d(x, x_0, edge_index, conv_w, conv_b,
                      bn_gamma, bn_beta, bn_mean, bn_var, eps=eps)
    out = jax.block_until_ready(out)

    ref = _reference(x, edge_index, conv_w, conv_b, bn_gamma, bn_beta, bn_mean, bn_var, eps)
    assert out.shape == (B, C_out, N, 1)
    assert jnp.allclose(out, ref, atol=1e-4, rtol=1e-4)
    print("KERNEL_OK")
</pallas_src>

<mosaic_0001>
module attributes {stable_mosaic.version = 11 : i64} {
  func.func @_edgeconv_kernel(%arg0: i32, %arg1: memref<1x8x16xi32, #tpu.memory_space<vmem>>, %arg2: memref<1x8x16xi32, #tpu.memory_space<vmem>>, %arg3: memref<1x32x16xf32, #tpu.memory_space<vmem>>, %arg4: memref<96x32xf32, #tpu.memory_space<vmem>>, %arg5: memref<48x1xf32, #tpu.memory_space<vmem>>, %arg6: memref<1x48x16xf32, #tpu.memory_space<vmem>>) attributes {dimension_semantics = [#tpu.dimension_semantics<parallel>], iteration_bounds = array<i64: 2>, scalar_prefetch = 0 : i64, scratch_operands = 0 : i64, tpu.core_type = #tpu.core_type<tc>, window_params = [{transform_indices = @transform_0, window_bounds = array<i64: 1, 8, 16>}, {transform_indices = @transform_1, window_bounds = array<i64: 1, 8, 16>}, {transform_indices = @transform_2, window_bounds = array<i64: 1, 32, 16>}, {pipeline_mode = #tpu.pipeline_mode<synchronous>, transform_indices = @transform_3, window_bounds = array<i64: 96, 32>}, {pipeline_mode = #tpu.pipeline_mode<synchronous>, transform_indices = @transform_4, window_bounds = array<i64: 48, 1>}, {transform_indices = @transform_5, window_bounds = array<i64: 1, 48, 16>}]} {
    %c0 = arith.constant 0 : index
    %c0_0 = arith.constant 0 : index
    %c0_1 = arith.constant 0 : index
    %0 = vector.load %arg3[%c0, %c0_0, %c0_1] : memref<1x32x16xf32, #tpu.memory_space<vmem>>, vector<1x32x16xf32>
    %1 = vector.shape_cast %0 : vector<1x32x16xf32> to vector<32x16xf32>
    %c0_2 = arith.constant 0 : index
    %c0_3 = arith.constant 0 : index
    %2 = vector.load %arg4[%c0_2, %c0_3] : memref<96x32xf32, #tpu.memory_space<vmem>>, vector<96x32xf32>
    %c0_4 = arith.constant 0 : index
    %c0_5 = arith.constant 0 : index
    %3 = vector.load %arg5[%c0_4, %c0_5] : memref<48x1xf32, #tpu.memory_space<vmem>>, vector<48x1xf32>
    %c0_6 = arith.constant 0 : index
    %c0_7 = arith.constant 0 : index
    %c0_8 = arith.constant 0 : index
    %4 = vector.load %arg1[%c0_6, %c0_7, %c0_8] : memref<1x8x16xi32, #tpu.memory_space<vmem>>, vector<1x8x16xi32>
    %5 = vector.shape_cast %4 : vector<1x8x16xi32> to vector<8x16xi32>
    %c0_9 = arith.constant 0 : index
    %c0_10 = arith.constant 0 : index
    %c0_11 = arith.constant 0 : index
    %6 = vector.load %arg2[%c0_9, %c0_10, %c0_11] : memref<1x8x16xi32, #tpu.memory_space<vmem>>, vector<1x8x16xi32>
    %7 = vector.shape_cast %6 : vector<1x8x16xi32> to vector<8x16xi32>
    %cst = arith.constant dense<0.000000e+00> : vector<96x16xf32>
    %8 = tpu.matmul %2, %1, %cst {dimension_numbers = #tpu.dot_dimension_numbers<[1], [0], [0], [1], [0, 0, 1, 1], [], []>} : vector<96x32xf32>, vector<32x16xf32>, vector<96x16xf32> -> vector<96x16xf32>
    %9 = vector.extract_strided_slice %8 {offsets = [0, 0], sizes = [48, 16], strides = [1, 1]} : vector<96x16xf32> to vector<48x16xf32>
    %10 = vector.extract_strided_slice %8 {offsets = [48, 0], sizes = [48, 16], strides = [1, 1]} : vector<96x16xf32> to vector<48x16xf32>
    %11 = tpu.iota {dimensions = array<i32: 0>} : vector<16x16xi32>
    %cst_12 = arith.constant -1.000000e+30 : f32
    %12 = vector.broadcast %cst_12 : f32 to vector<48x16xf32>
    %13 = vector.extract_strided_slice %5 {offsets = [0, 0], sizes = [1, 16], strides = [1, 1]} : vector<8x16xi32> to vector<1x16xi32>
    %14 = vector.extract_strided_slice %7 {offsets = [0, 0], sizes = [1, 16], strides = [1, 1]} : vector<8x16xi32> to vector<1x16xi32>
    %15 = vector.broadcast %13 : vector<1x16xi32> to vector<16x16xi32>
    %16 = arith.cmpi eq, %11, %15 : vector<16x16xi32>
    %17 = arith.extui %16 : vector<16x16xi1> to vector<16x16xi32>
    %18 = arith.sitofp %17 : vector<16x16xi32> to vector<16x16xf32>
    %cst_13 = arith.constant dense<0.000000e+00> : vector<48x16xf32>
    %19 = tpu.matmul %9, %18, %cst_13 {dimension_numbers = #tpu.dot_dimension_numbers<[1], [0], [0], [1], [0, 0, 1, 1], [], []>} : vector<48x16xf32>, vector<16x16xf32>, vector<48x16xf32> -> vector<48x16xf32>
    %20 = vector.broadcast %14 : vector<1x16xi32> to vector<16x16xi32>
    %21 = arith.cmpi eq, %11, %20 : vector<16x16xi32>
    %22 = arith.extui %21 : vector<16x16xi1> to vector<16x16xi32>
    %23 = arith.sitofp %22 : vector<16x16xi32> to vector<16x16xf32>
    %cst_14 = arith.constant dense<0.000000e+00> : vector<48x16xf32>
    %24 = tpu.matmul %10, %23, %cst_14 {dimension_numbers = #tpu.dot_dimension_numbers<[1], [0], [0], [1], [0, 0, 1, 1], [], []>} : vector<48x16xf32>, vector<16x16xf32>, vector<48x16xf32> -> vector<48x16xf32>
    %25 = arith.addf %19, %24 : vector<48x16xf32>
    %26 = vector.broadcast %3 : vector<48x1xf32> to vector<48x16xf32>
    %27 = arith.addf %25, %26 : vector<48x16xf32>
    %cst_15 = arith.constant 0.000000e+00 : f32
    %28 = vector.broadcast %cst_15 : f32 to vector<48x16xf32>
    %29 = arith.maximumf %27, %28 : vector<48x16xf32>
    %30 = arith.cmpi eq, %14, %13 : vector<1x16xi32>
    %cst_16 = arith.constant -1.000000e+30 : f32
    %31 = vector.shape_cast %30 : vector<1x16xi1> to vector<1x16xi1>
    %32 = vector.broadcast %31 : vector<1x16xi1> to vector<48x16xi1>
    %33 = vector.broadcast %cst_16 : f32 to vector<48x16xf32>
    %34 = arith.select %32, %33, %29 : vector<48x16xi1>, vector<48x16xf32>
    %35 = arith.maximumf %12, %34 : vector<48x16xf32>
    %36 = vector.extract_strided_slice %5 {offsets = [1, 0], sizes = [1, 16], strides = [1, 1]} : vector<8x16xi32> to vector<1x16xi32>
    %37 = vector.extract_strided_slice %7 {offsets = [1, 0], sizes = [1, 16], strides = [1, 1]} : vector<8x16xi32> to vector<1x16xi32>
    %38 = vector.broadcast %36 : vector<1x16xi32> to vector<16x16xi32>
    %39 = arith.cmpi eq, %11, %38 : vector<16x16xi32>
    %40 = arith.extui %39 : vector<16x16xi1> to vector<16x16xi32>
    %41 = arith.sitofp %40 : vector<16x16xi32> to vector<16x16xf32>
    %cst_17 = arith.constant dense<0.000000e+00> : vector<48x16xf32>
    %42 = tpu.matmul %9, %41, %cst_17 {dimension_numbers = #tpu.dot_dimension_numbers<[1], [0], [0], [1], [0, 0, 1, 1], [], []>} : vector<48x16xf32>, vector<16x16xf32>, vector<48x16xf32> -> vector<48x16xf32>
    %43 = vector.broadcast %37 : vector<1x16xi32> to vector<16x16xi32>
    %44 = arith.cmpi eq, %11, %43 : vector<16x16xi32>
    %45 = arith.extui %44 : vector<16x16xi1> to vector<16x16xi32>
    %46 = arith.sitofp %45 : vector<16x16xi32> to vector<16x16xf32>
    %cst_18 = arith.constant dense<0.000000e+00> : vector<48x16xf32>
    %47 = tpu.matmul %10, %46, %cst_18 {dimension_numbers = #tpu.dot_dimension_numbers<[1], [0], [0], [1], [0, 0, 1, 1], [], []>} : vector<48x16xf32>, vector<16x16xf32>, vector<48x16xf32> -> vector<48x16xf32>
    %48 = arith.addf %42, %47 : vector<48x16xf32>
    %49 = vector.broadcast %3 : vector<48x1xf32> to vector<48x16xf32>
    %50 = arith.addf %48, %49 : vector<48x16xf32>
    %cst_19 = arith.constant 0.000000e+00 : f32
    %51 = vector.broadcast %cst_19 : f32 to vector<48x16xf32>
    %52 = arith.maximumf %50, %51 : vector<48x16xf32>
    %53 = arith.cmpi eq, %37, %36 : vector<1x16xi32>
    %cst_20 = arith.constant -1.000000e+30 : f32
    %54 = vector.shape_cast %53 : vector<1x16xi1> to vector<1x16xi1>
    %55 = vector.broadcast %54 : vector<1x16xi1> to vector<48x16xi1>
    %56 = vector.broadcast %cst_20 : f32 to vector<48x16xf32>
    %57 = arith.select %55, %56, %52 : vector<48x16xi1>, vector<48x16xf32>
    %58 = arith.maximumf %35, %57 : vector<48x16xf32>
    %59 = vector.extract_strided_slice %5 {offsets = [2, 0], sizes = [1, 16], strides = [1, 1]} : vector<8x16xi32> to vector<1x16xi32>
    %60 = vector.extract_strided_slice %7 {offsets = [2, 0], sizes = [1, 16], strides = [1, 1]} : vector<8x16xi32> to vector<1x16xi32>
    %61 = vector.broadcast %59 : vector<1x16xi32> to vector<16x16xi32>
    %62 = arith.cmpi eq, %11, %61 : vector<16x16xi32>
    %63 = arith.extui %62 : vector<16x16xi1> to vector<16x16xi32>
    %64 = arith.sitofp %63 : vector<16x16xi32> to vector<16x16xf32>
    %cst_21 = arith.constant dense<0.000000e+00> : vector<48x16xf32>
    %65 = tpu.matmul %9, %64, %cst_21 {dimension_numbers = #tpu.dot_dimension_numbers<[1], [0], [0], [1], [0, 0, 1, 1], [], []>} : vector<48x16xf32>, vector<16x16xf32>, vector<48x16xf32> -> vector<48x16xf32>
    %66 = vector.broadcast %60 : vector<1x16xi32> to vector<16x16xi32>
    %67 = arith.cmpi eq, %11, %66 : vector<16x16xi32>
    %68 = arith.extui %67 : vector<16x16xi1> to vector<16x16xi32>
    %69 = arith.sitofp %68 : vector<16x16xi32> to vector<16x16xf32>
    %cst_22 = arith.constant dense<0.000000e+00> : vector<48x16xf32>
    %70 = tpu.matmul %10, %69, %cst_22 {dimension_numbers = #tpu.dot_dimension_numbers<[1], [0], [0], [1], [0, 0, 1, 1], [], []>} : vector<48x16xf32>, vector<16x16xf32>, vector<48x16xf32> -> vector<48x16xf32>
    %71 = arith.addf %65, %70 : vector<48x16xf32>
    %72 = vector.broadcast %3 : vector<48x1xf32> to vector<48x16xf32>
    %73 = arith.addf %71, %72 : vector<48x16xf32>
    %cst_23 = arith.constant 0.000000e+00 : f32
    %74 = vector.broadcast %cst_23 : f32 to vector<48x16xf32>
    %75 = arith.maximumf %73, %74 : vector<48x16xf32>
    %76 = arith.cmpi eq, %60, %59 : vector<1x16xi32>
    %cst_24 = arith.constant -1.000000e+30 : f32
    %77 = vector.shape_cast %76 : vector<1x16xi1> to vector<1x16xi1>
    %78 = vector.broadcast %77 : vector<1x16xi1> to vector<48x16xi1>
    %79 = vector.broadcast %cst_24 : f32 to vector<48x16xf32>
    %80 = arith.select %78, %79, %75 : vector<48x16xi1>, vector<48x16xf32>
    %81 = arith.maximumf %58, %80 : vector<48x16xf32>
    %82 = vector.extract_strided_slice %5 {offsets = [3, 0], sizes = [1, 16], strides = [1, 1]} : vector<8x16xi32> to vector<1x16xi32>
    %83 = vector.extract_strided_slice %7 {offsets = [3, 0], sizes = [1, 16], strides = [1, 1]} : vector<8x16xi32> to vector<1x16xi32>
    %84 = vector.broadcast %82 : vector<1x16xi32> to vector<16x16xi32>
    %85 = arith.cmpi eq, %11, %84 : vector<16x16xi32>
    %86 = arith.extui %85 : vector<16x16xi1> to vector<16x16xi32>
    %87 = arith.sitofp %86 : vector<16x16xi32> to vector<16x16xf32>
    %cst_25 = arith.constant dense<0.000000e+00> : vector<48x16xf32>
    %88 = tpu.matmul %9, %87, %cst_25 {dimension_numbers = #tpu.dot_dimension_numbers<[1], [0], [0], [1], [0, 0, 1, 1], [], []>} : vector<48x16xf32>, vector<16x16xf32>, vector<48x16xf32> -> vector<48x16xf32>
    %89 = vector.broadcast %83 : vector<1x16xi32> to vector<16x16xi32>
    %90 = arith.cmpi eq, %11, %89 : vector<16x16xi32>
    %91 = arith.extui %90 : vector<16x16xi1> to vector<16x16xi32>
    %92 = arith.sitofp %91 : vector<16x16xi32> to vector<16x16xf32>
    %cst_26 = arith.constant dense<0.000000e+00> : vector<48x16xf32>
    %93 = tpu.matmul %10, %92, %cst_26 {dimension_numbers = #tpu.dot_dimension_numbers<[1], [0], [0], [1], [0, 0, 1, 1], [], []>} : vector<48x16xf32>, vector<16x16xf32>, vector<48x16xf32> -> vector<48x16xf32>
    %94 = arith.addf %88, %93 : vector<48x16xf32>
    %95 = vector.broadcast %3 : vector<48x1xf32> to vector<48x16xf32>
    %96 = arith.addf %94, %95 : vector<48x16xf32>
    %cst_27 = arith.constant 0.000000e+00 : f32
    %97 = vector.broadcast %cst_27 : f32 to vector<48x16xf32>
    %98 = arith.maximumf %96, %97 : vector<48x16xf32>
    %99 = arith.cmpi eq, %83, %82 : vector<1x16xi32>
    %cst_28 = arith.constant -1.000000e+30 : f32
    %100 = vector.shape_cast %99 : vector<1x16xi1> to vector<1x16xi1>
    %101 = vector.broadcast %100 : vector<1x16xi1> to vector<48x16xi1>
    %102 = vector.broadcast %cst_28 : f32 to vector<48x16xf32>
    %103 = arith.select %101, %102, %98 : vector<48x16xi1>, vector<48x16xf32>
    %104 = arith.maximumf %81, %103 : vector<48x16xf32>
    %105 = vector.extract_strided_slice %5 {offsets = [4, 0], sizes = [1, 16], strides = [1, 1]} : vector<8x16xi32> to vector<1x16xi32>
    %106 = vector.extract_strided_slice %7 {offsets = [4, 0], sizes = [1, 16], strides = [1, 1]} : vector<8x16xi32> to vector<1x16xi32>
    %107 = vector.broadcast %105 : vector<1x16xi32> to vector<16x16xi32>
    %108 = arith.cmpi eq, %11, %107 : vector<16x16xi32>
    %109 = arith.extui %108 : vector<16x16xi1> to vector<16x16xi32>
    %110 = arith.sitofp %109 : vector<16x16xi32> to vector<16x16xf32>
    %cst_29 = arith.constant dense<0.000000e+00> : vector<48x16xf32>
    %111 = tpu.matmul %9, %110, %cst_29 {dimension_numbers = #tpu.dot_dimension_numbers<[1], [0], [0], [1], [0, 0, 1, 1], [], []>} : vector<48x16xf32>, vector<16x16xf32>, vector<48x16xf32> -> vector<48x16xf32>
    %112 = vector.broadcast %106 : vector<1x16xi32> to vector<16x16xi32>
    %113 = arith.cmpi eq, %11, %112 : vector<16x16xi32>
    %114 = arith.extui %113 : vector<16x16xi1> to vector<16x16xi32>
    %115 = arith.sitofp %114 : vector<16x16xi32> to vector<16x16xf32>
    %cst_30 = arith.constant dense<0.000000e+00> : vector<48x16xf32>
    %116 = tpu.matmul %10, %115, %cst_30 {dimension_numbers = #tpu.dot_dimension_numbers<[1], [0], [0], [1], [0, 0, 1, 1], [], []>} : vector<48x16xf32>, vector<16x16xf32>, vector<48x16xf32> -> vector<48x16xf32>
    %117 = arith.addf %111, %116 : vector<48x16xf32>
    %118 = vector.broadcast %3 : vector<48x1xf32> to vector<48x16xf32>
    %119 = arith.addf %117, %118 : vector<48x16xf32>
    %cst_31 = arith.constant 0.000000e+00 : f32
    %120 = vector.broadcast %cst_31 : f32 to vector<48x16xf32>
    %121 = arith.maximumf %119, %120 : vector<48x16xf32>
    %122 = arith.cmpi eq, %106, %105 : vector<1x16xi32>
    %cst_32 = arith.constant -1.000000e+30 : f32
    %123 = vector.shape_cast %122 : vector<1x16xi1> to vector<1x16xi1>
    %124 = vector.broadcast %123 : vector<1x16xi1> to vector<48x16xi1>
    %125 = vector.broadcast %cst_32 : f32 to vector<48x16xf32>
    %126 = arith.select %124, %125, %121 : vector<48x16xi1>, vector<48x16xf32>
    %127 = arith.maximumf %104, %126 : vector<48x16xf32>
    %128 = vector.extract_strided_slice %5 {offsets = [5, 0], sizes = [1, 16], strides = [1, 1]} : vector<8x16xi32> to vector<1x16xi32>
    %129 = vector.extract_strided_slice %7 {offsets = [5, 0], sizes = [1, 16], strides = [1, 1]} : vector<8x16xi32> to vector<1x16xi32>
    %130 = vector.broadcast %128 : vector<1x16xi32> to vector<16x16xi32>
    %131 = arith.cmpi eq, %11, %130 : vector<16x16xi32>
    %132 = arith.extui %131 : vector<16x16xi1> to vector<16x16xi32>
    %133 = arith.sitofp %132 : vector<16x16xi32> to vector<16x16xf32>
    %cst_33 = arith.constant dense<0.000000e+00> : vector<48x16xf32>
    %134 = tpu.matmul %9, %133, %cst_33 {dimension_numbers = #tpu.dot_dimension_numbers<[1], [0], [0], [1], [0, 0, 1, 1], [], []>} : vector<48x16xf32>, vector<16x16xf32>, vector<48x16xf32> -> vector<48x16xf32>
    %135 = vector.broadcast %129 : vector<1x16xi32> to vector<16x16xi32>
    %136 = arith.cmpi eq, %11, %135 : vector<16x16xi32>
    %137 = arith.extui %136 : vector<16x16xi1> to vector<16x16xi32>
    %138 = arith.sitofp %137 : vector<16x16xi32> to vector<16x16xf32>
    %cst_34 = arith.constant dense<0.000000e+00> : vector<48x16xf32>
    %139 = tpu.matmul %10, %138, %cst_34 {dimension_numbers = #tpu.dot_dimension_numbers<[1], [0], [0], [1], [0, 0, 1, 1], [], []>} : vector<48x16xf32>, vector<16x16xf32>, vector<48x16xf32> -> vector<48x16xf32>
    %140 = arith.addf %134, %139 : vector<48x16xf32>
    %141 = vector.broadcast %3 : vector<48x1xf32> to vector<48x16xf32>
    %142 = arith.addf %140, %141 : vector<48x16xf32>
    %cst_35 = arith.constant 0.000000e+00 : f32
    %143 = vector.broadcast %cst_35 : f32 to vector<48x16xf32>
    %144 = arith.maximumf %142, %143 : vector<48x16xf32>
    %145 = arith.cmpi eq, %129, %128 : vector<1x16xi32>
    %cst_36 = arith.constant -1.000000e+30 : f32
    %146 = vector.shape_cast %145 : vector<1x16xi1> to vector<1x16xi1>
    %147 = vector.broadcast %146 : vector<1x16xi1> to vector<48x16xi1>
    %148 = vector.broadcast %cst_36 : f32 to vector<48x16xf32>
    %149 = arith.select %147, %148, %144 : vector<48x16xi1>, vector<48x16xf32>
    %150 = arith.maximumf %127, %149 : vector<48x16xf32>
    %151 = vector.extract_strided_slice %5 {offsets = [6, 0], sizes = [1, 16], strides = [1, 1]} : vector<8x16xi32> to vector<1x16xi32>
    %152 = vector.extract_strided_slice %7 {offsets = [6, 0], sizes = [1, 16], strides = [1, 1]} : vector<8x16xi32> to vector<1x16xi32>
    %153 = vector.broadcast %151 : vector<1x16xi32> to vector<16x16xi32>
    %154 = arith.cmpi eq, %11, %153 : vector<16x16xi32>
    %155 = arith.extui %154 : vector<16x16xi1> to vector<16x16xi32>
    %156 = arith.sitofp %155 : vector<16x16xi32> to vector<16x16xf32>
    %cst_37 = arith.constant dense<0.000000e+00> : vector<48x16xf32>
    %157 = tpu.matmul %9, %156, %cst_37 {dimension_numbers = #tpu.dot_dimension_numbers<[1], [0], [0], [1], [0, 0, 1, 1], [], []>} : vector<48x16xf32>, vector<16x16xf32>, vector<48x16xf32> -> vector<48x16xf32>
    %158 = vector.broadcast %152 : vector<1x16xi32> to vector<16x16xi32>
    %159 = arith.cmpi eq, %11, %158 : vector<16x16xi32>
    %160 = arith.extui %159 : vector<16x16xi1> to vector<16x16xi32>
    %161 = arith.sitofp %160 : vector<16x16xi32> to vector<16x16xf32>
    %cst_38 = arith.constant dense<0.000000e+00> : vector<48x16xf32>
    %162 = tpu.matmul %10, %161, %cst_38 {dimension_numbers = #tpu.dot_dimension_numbers<[1], [0], [0], [1], [0, 0, 1, 1], [], []>} : vector<48x16xf32>, vector<16x16xf32>, vector<48x16xf32> -> vector<48x16xf32>
    %163 = arith.addf %157, %162 : vector<48x16xf32>
    %164 = vector.broadcast %3 : vector<48x1xf32> to vector<48x16xf32>
    %165 = arith.addf %163, %164 : vector<48x16xf32>
    %cst_39 = arith.constant 0.000000e+00 : f32
    %166 = vector.broadcast %cst_39 : f32 to vector<48x16xf32>
    %167 = arith.maximumf %165, %166 : vector<48x16xf32>
    %168 = arith.cmpi eq, %152, %151 : vector<1x16xi32>
    %cst_40 = arith.constant -1.000000e+30 : f32
    %169 = vector.shape_cast %168 : vector<1x16xi1> to vector<1x16xi1>
    %170 = vector.broadcast %169 : vector<1x16xi1> to vector<48x16xi1>
    %171 = vector.broadcast %cst_40 : f32 to vector<48x16xf32>
    %172 = arith.select %170, %171, %167 : vector<48x16xi1>, vector<48x16xf32>
    %173 = arith.maximumf %150, %172 : vector<48x16xf32>
    %174 = vector.extract_strided_slice %5 {offsets = [7, 0], sizes = [1, 16], strides = [1, 1]} : vector<8x16xi32> to vector<1x16xi32>
    %175 = vector.extract_strided_slice %7 {offsets = [7, 0], sizes = [1, 16], strides = [1, 1]} : vector<8x16xi32> to vector<1x16xi32>
    %176 = vector.broadcast %174 : vector<1x16xi32> to vector<16x16xi32>
    %177 = arith.cmpi eq, %11, %176 : vector<16x16xi32>
    %178 = arith.extui %177 : vector<16x16xi1> to vector<16x16xi32>
    %179 = arith.sitofp %178 : vector<16x16xi32> to vector<16x16xf32>
    %cst_41 = arith.constant dense<0.000000e+00> : vector<48x16xf32>
    %180 = tpu.matmul %9, %179, %cst_41 {dimension_numbers = #tpu.dot_dimension_numbers<[1], [0], [0], [1], [0, 0, 1, 1], [], []>} : vector<48x16xf32>, vector<16x16xf32>, vector<48x16xf32> -> vector<48x16xf32>
    %181 = vector.broadcast %175 : vector<1x16xi32> to vector<16x16xi32>
    %182 = arith.cmpi eq, %11, %181 : vector<16x16xi32>
    %183 = arith.extui %182 : vector<16x16xi1> to vector<16x16xi32>
    %184 = arith.sitofp %183 : vector<16x16xi32> to vector<16x16xf32>
    %cst_42 = arith.constant dense<0.000000e+00> : vector<48x16xf32>
    %185 = tpu.matmul %10, %184, %cst_42 {dimension_numbers = #tpu.dot_dimension_numbers<[1], [0], [0], [1], [0, 0, 1, 1], [], []>} : vector<48x16xf32>, vector<16x16xf32>, vector<48x16xf32> -> vector<48x16xf32>
    %186 = arith.addf %180, %185 : vector<48x16xf32>
    %187 = vector.broadcast %3 : vector<48x1xf32> to vector<48x16xf32>
    %188 = arith.addf %186, %187 : vector<48x16xf32>
    %cst_43 = arith.constant 0.000000e+00 : f32
    %189 = vector.broadcast %cst_43 : f32 to vector<48x16xf32>
    %190 = arith.maximumf %188, %189 : vector<48x16xf32>
    %191 = arith.cmpi eq, %175, %174 : vector<1x16xi32>
    %cst_44 = arith.constant -1.000000e+30 : f32
    %192 = vector.shape_cast %191 : vector<1x16xi1> to vector<1x16xi1>
    %193 = vector.broadcast %192 : vector<1x16xi1> to vector<48x16xi1>
    %194 = vector.broadcast %cst_44 : f32 to vector<48x16xf32>
    %195 = arith.select %193, %194, %190 : vector<48x16xi1>, vector<48x16xf32>
    %196 = arith.maximumf %173, %195 : vector<48x16xf32>
    %c0_45 = arith.constant 0 : index
    %c0_46 = arith.constant 0 : index
    %c0_47 = arith.constant 0 : index
    %197 = vector.load %arg6[%c0_45, %c0_46, %c0_47] : memref<1x48x16xf32, #tpu.memory_space<vmem>>, vector<1x48x16xf32>
    %198 = vector.shape_cast %197 : vector<1x48x16xf32> to vector<48x16xf32>
    %199 = vector.shape_cast %196 : vector<48x16xf32> to vector<1x48x16xf32>
    tpu.vector_store %arg6[%c0_45, %c0_46, %c0_47], %199 {strides = array<i32>} : memref<1x48x16xf32, #tpu.memory_space<vmem>>, vector<1x48x16xf32>,
    return
  }
  func.func @transform_0(%arg0: i32) -> (i32, i32, i32) {
    %c0_i32 = arith.constant 0 : i32
    %c0_i32_0 = arith.constant 0 : i32
    %c0_i32_1 = arith.constant 0 : i32
    return %arg0, %c0_i32, %c0_i32_0 : i32, i32, i32
  }
  func.func @transform_1(%arg0: i32) -> (i32, i32, i32) {
    %c0_i32 = arith.constant 0 : i32
    %c0_i32_0 = arith.constant 0 : i32
    %c0_i32_1 = arith.constant 0 : i32
    return %arg0, %c0_i32, %c0_i32_0 : i32, i32, i32
  }
  func.func @transform_2(%arg0: i32) -> (i32, i32, i32) {
    %c0_i32 = arith.constant 0 : i32
    %c0_i32_0 = arith.constant 0 : i32
    %c0_i32_1 = arith.constant 0 : i32
    return %arg0, %c0_i32, %c0_i32_0 : i32, i32, i32
  }
  func.func @transform_3(%arg0: i32) -> (i32, i32) {
    %c0_i32 = arith.constant 0 : i32
    %c0_i32_0 = arith.constant 0 : i32
    %c0_i32_1 = arith.constant 0 : i32
    return %c0_i32, %c0_i32_0 : i32, i32
  }
  func.func @transform_4(%arg0: i32) -> (i32, i32) {
    %c0_i32 = arith.constant 0 : i32
    %c0_i32_0 = arith.constant 0 : i32
    %c0_i32_1 = arith.constant 0 : i32
    return %c0_i32, %c0_i32_0 : i32, i32
  }
  func.func @transform_5(%arg0: i32) -> (i32, i32, i32) {
    %c0_i32 = arith.constant 0 : i32
    %c0_i32_0 = arith.constant 0 : i32
    %c0_i32_1 = arith.constant 0 : i32
    return %arg0, %c0_i32, %c0_i32_0 : i32, i32, i32
  }
}

</mosaic_0001>

<bundles_post_ra>
// kernel: tpu_custom_call.1
= control target key start
LH: loop header
LB: loop body
LE: loop exit
PB: predicated region body
PF: predicated region fallthrough
CT: control target
= control target key end

     0   :  { %s1653_s18 = smov 0   ;;  %s2362_s0 = inlined_call_operand.vmem [shape: s32[2,8,16], index: 0, kind: input, shape index: {}]   ;;  %s2363_s1 = inlined_call_operand.vmem [shape: s32[2,8,16], index: 1, kind: input, shape index: {}]   ;;  %s2364_s2 = inlined_call_operand.vmem [shape: f32[2,32,16], index: 2, kind: input, shape index: {}]   ;;  %s2365_s3 = inlined_call_operand.vmem [shape: f32[96,32], index: 3, kind: input, shape index: {}]   ;;  %s2366_s4 = inlined_call_operand.vmem [shape: f32[48,1], index: 4, kind: input, shape index: {}]   ;;  %s2367_s5 = inlined_call_operand.vmem [shape: f32[2,48,16], index: 5, kind: output, shape index: {}]  }
   0x1 LB: > { %s1410_s19 = sadd.s32 4294967295, %s1619_s18   ;;  %p1414_p0 = scmp.ge.s32.totalorder %s1619_s18, 1  ;;  %s1619_s18 = sphi %s1653_s18, %s15_s18  }
   0x2   : > { %p205_p1 = scmp.lt.s32.totalorder %s1619_s18, 3 }
   0x4   : > { %p206_p2 = pnand %p1414_p0, %p205_p1 }
   0x5   : > { %p241_p3 = scmp.lt.s32.totalorder (!%p206_p2), %s1410_s19, 1 }
   0x6   : > { %209 = sbr.rel (%p206_p2) target bundleno = 572 (0x23c), region = 40 }
   0xb   : > { %s2385_s19 = smov (!%p241_p3, %s1410_s19), 1  ;;  %v263_v4 = vld [vmem:[%s2365_s3] sm:$0xff]  ;;  %vm283_vm0 = vcmask 261120   ;;  %v264_v5 = vld [vmem:[%s2365_s3 + $0x8] sm:$0xff]  ;;  %v265_v6 = vld [vmem:[%s2365_s3 + $0x10] sm:$0xff]  ;;  %v373_v13 = vlaneseq  ;;  %v1621_v18 = vmov 1.0  }
   0xc   : > { %s1594_s20 = sshll.u32 %s2385_s19, 5  ;;  %v266_v7 = vld [vmem:[%s2365_s3 + $0x18] sm:$0xff]  ;;  %v267_v8 = vld [vmem:[%s2365_s3 + $0x20] sm:$0xff]  ;;  %v268_v9 = vld [vmem:[%s2365_s3 + $0x28] sm:$0xff]  ;;  %s1415_s13 = sshll.u32 %s2385_s19, 3  ;;  %vm390_vm5 = vcmask 130048  }
   0xd   : > { %s253_s23 = scalar_lea.vmem %s2364_s2, %s1594_s20  ;;  %v269_v10 = vld [vmem:[%s2365_s3 + $0x30] sm:$0xff]  ;;  %s244_s16 = scalar_lea.vmem %s2362_s0, %s1415_s13  ;;  %v270_v11 = vld [vmem:[%s2365_s3 + $0x38] sm:$0xff]  ;;  %v1707_v14 = vshrl.u32 %v373_v13, 7  ;;  %v271_v17 = vld [vmem:[%s2365_s3 + $0x40] sm:$0xff]  ;;  %v1622_v32 = vmov 0  }
   0xe   : > { %v262_v0 = vld [vmem:[%s253_s23 + $0x18] sm:$0xff]  ;;  %v261_v1 = vld [vmem:[%s253_s23 + $0x10] sm:$0xff]  ;;  %v260_v2 = vld [vmem:[%s253_s23 + $0x8] sm:$0xff]  ;;  %s248_s6 = scalar_lea.vmem %s2363_s1, %s1415_s13  ;;  %1610 = vset.pattern.permute.xlu0 %v1622_v32  ;;  %1611 = vset.pattern.permute.xlu1 %v1622_v32  ;;  %s1599_s21 = smul.u32 48, %s2385_s19 }
   0xf   : > { %332 = vmatpush.msra.mxu0 %v262_v0  ;;  %v259_v3 = vld [vmem:[%s253_s23] sm:$0xff]  ;;  %v1711_v16 = vadd.s32 8, %v1707_v14  ;;  %v272_v19 = vld [vmem:[%s2365_s3 + $0x48] sm:$0xff]  ;;  %v273_v20 = vld [vmem:[%s2365_s3 + $0x50] sm:$0xff]  ;;  %1612 = vset.pattern.permute.xlu2 %v1622_v32 }
  0x10   : > { %v1704_v12 = vld [vmem:[%s244_s16] sm:$0xff]  ;;  %v274_v21 = vld [vmem:[%s2365_s3 + $0x58] sm:$0xff]  ;;  %v276_v34 = vld [vmem:[%s2366_s4 + $0x8] sm:$0xff]  ;;  %s2308_s24 = scalar_lea.vmem %s2367_s5, %s1599_s21 }
  0x11   : > { %333 = vmatpush.msra.mxu0 %v261_v1  ;;  %v376_v15 = vperm.slane %v1704_v12, 0  ;;  %v885_v22 = vperm.slane %v1704_v12, 4  ;;  %v1749_v24 = vld [vmem:[%s248_s6] sm:$0xff]  ;;  %v1105_v31 = vperm.slane %v1704_v12, 6  ;;  %v555_v36 = vperm.slane %v1704_v12, 1  ;;  %v277_v37 = vld [vmem:[%s2366_s4 + $0x10] sm:$0xff] }
  0x12   : > { %v383_v26 = vperm.slane %v1749_v24, 0  ;;  %v672_v27 = vperm.slane %v1749_v24, 2  ;;  %v275_v30 = vld [vmem:[%s2366_s4] sm:$0xff]  ;;  %509 = vperm.xlu1 %1611, %v277_v37   ;;  %v562_v39 = vperm.slane %v1749_v24, 1  ;;  %v278_v40 = vld [vmem:[%s2366_s4 + $0x18] sm:$0xff]  ;;  %v775_v42 = vperm.slane %v1704_v12, 3 }
  0x13   : > { %334 = vmatpush.msra.mxu0 %v260_v2  ;;  %vm378_vm1 = vcmp.eq.s32.totalorder %v1711_v16, %v376_v15  ;;  %vm377_vm2 = vcmp.eq.s32.totalorder %v1707_v14, %v376_v15  ;;  %vm887_vm3 = vcmp.eq.s32.totalorder %v1711_v16, %v885_v22  ;;  %vm886_vm4 = vcmp.eq.s32.totalorder %v1707_v14, %v885_v22  ;;  %v279_v49 = vld [vmem:[%s2366_s4 + $0x20] sm:$0xff]  ;;  %v280_v50 = vld [vmem:[%s2366_s4 + $0x28] sm:$0xff] }
  0x14   : > { %1597 = vmatpush.msk.msra.mxu2 %vm378_vm1, %v1621_v18  ;;  %vm385_vm6 = vcmp.eq.s32.totalorder %v1711_v16, %v383_v26  ;;  %vm674_vm7 = vcmp.eq.s32.totalorder %v1711_v16, %v672_v27  ;;  %vm384_vm8 = vcmp.eq.s32.totalorder %v1707_v14, %v383_v26  ;;  %vm673_vm9 = vcmp.eq.s32.totalorder %v1707_v14, %v672_v27 }
  0x15   : > { %335 = vmatpush.msra.mxu0 %v259_v3  ;;  %1436 = vmatpush.msk.msra.mxu1 %vm385_vm6, %v1621_v18  ;;  %vm1107_vm10 = vcmp.eq.s32.totalorder %v1711_v16, %v1105_v31  ;;  %vm1106_vm11 = vcmp.eq.s32.totalorder %v1707_v14, %v1105_v31  ;;  %vm557_vm12 = vcmp.eq.s32.totalorder %v1711_v16, %v555_v36  ;;  %v782_v45 = vperm.slane %v1749_v24, 3 }
  0x16   : > { %1420 = vmatmul.msk.f32.vlgmr.msra.gmra.mxu0 %vm283_vm0, %v263_v4  ;;  %1598 = vmatpush.msk.msra.mxu2 %vm377_vm2, %v1621_v18  ;;  %vm556_vm13 = vcmp.eq.s32.totalorder %v1707_v14, %v555_v36  ;;  %vm564_vm14 = vcmp.eq.s32.totalorder %v1711_v16, %v562_v39  ;;  %vm563_vm15 = vcmp.eq.s32.totalorder %v1707_v14, %v562_v39  ;;  %v665_v46 = vperm.slane %v1704_v12, 2 }
  0x17   : > { %1444 = vmatpush.msk.msrb.mxu0 %vm378_vm1, %v1621_v18  ;;  %1595 = vmatpush.msk.msra.mxu3 %vm385_vm6, %v1621_v18  ;;  %vm776_vm1 = vcmp.eq.s32.totalorder %v1707_v14, %v775_v42  ;;  %vm783_vm6 = vcmp.eq.s32.totalorder %v1707_v14, %v782_v45  ;;  %v995_v51 = vperm.slane %v1704_v12, 5  ;;  %v892_v52 = vperm.slane %v1749_v24, 4 }
  0x18   : > { %1476 = vmatpush.msk.msrb.mxu2 %vm674_vm7, %v1621_v18  ;;  %1437 = vmatpush.msk.msra.mxu1 %vm384_vm8, %v1621_v18  ;;  %v1002_v53 = vperm.slane %v1749_v24, 5  ;;  %v1215_v56 = vperm.slane %v1704_v12, 7  ;;  %v1112_v57 = vperm.slane %v1749_v24, 6  ;;  %v1222_v59 = vperm.slane %v1749_v24, 7 }
  0x19   : > { %1445 = vmatpush.msk.msrb.mxu0 %vm377_vm2, %v1621_v18  ;;  %1596 = vmatpush.msk.msra.mxu3 %vm384_vm8, %v1621_v18  ;;  %vm784_vm2 = vcmp.eq.s32.totalorder %v1711_v16, %v782_v45  ;;  %vm997_vm7 = vcmp.eq.s32.totalorder %v1711_v16, %v995_v51  ;;  %vm996_vm8 = vcmp.eq.s32.totalorder %v1707_v14, %v995_v51 }
  0x1a   : > { %1477 = vmatpush.msk.msrb.mxu2 %vm673_vm9, %v1621_v18  ;;  %499 = vperm.xlu0 %1610, %v275_v30   ;;  %vm894_vm9 = vcmp.eq.s32.totalorder %v1711_v16, %v892_v52 }
  0x1b   : > { %1524 = vmatpush.msk.msra.mxu0 %vm887_vm3, %v1621_v18  ;;  %1464 = vmatpush.msk.msrb.mxu1 %vm557_vm12, %v1621_v18  ;;  %vm667_vm3 = vcmp.eq.s32.totalorder %v1711_v16, %v665_v46  ;;  %vm1003_vm12 = vcmp.eq.s32.totalorder %v1707_v14, %v1002_v53 }
  0x1c   : > { %514 = vperm.xlu1 %1611, %v278_v40   ;;  %1456 = vmatpush.msk.msrb.mxu3 %vm564_vm14, %v1621_v18  ;;  %vm1216_vm14 = vcmp.eq.s32.totalorder %v1707_v14, %v1215_v56 }
  0x1d   : > { %1525 = vmatpush.msk.msra.mxu0 %vm886_vm4, %v1621_v18  ;;  %1465 = vmatpush.msk.msrb.mxu1 %vm556_vm13, %v1621_v18  ;;  %vm666_vm4 = vcmp.eq.s32.totalorder %v1707_v14, %v665_v46  ;;  %vm1217_vm13 = vcmp.eq.s32.totalorder %v1711_v16, %v1215_v56 }
  0x1e   : > { %1421 = vmatmul.msk.f32.gmra.mxu0 %vm283_vm0, %v264_v5  ;;  %1457 = vmatpush.msk.msrb.mxu3 %vm563_vm15, %v1621_v18  ;;  %vm1114_vm15 = vcmp.eq.s32.totalorder %v1711_v16, %v1112_v57 }
  0x1f   : > { %519 = vperm.xlu2 %1612, %v279_v49  }
  0x22   : > { %504 = vperm.xlu0 %1610, %v276_v34  }
  0x26   : > { %1422 = vmatmul.msk.f32.gmra.mxu0 %vm283_vm0, %v265_v6 }
  0x27   : > { %524 = vperm.xlu2 %1612, %v280_v50  }
  0x2e   : > { %1423 = vmatmul.msk.f32.gmra.mxu0 %vm283_vm0, %v266_v7 }
  0x36   : > { %1424 = vmatmul.msk.f32.gmra.mxu0 %vm283_vm0, %v267_v8 }
  0x3e   : > { %1425 = vmatmul.msk.f32.gmra.mxu0 %vm283_vm0, %v268_v9 }
  0x46   : > { %1426 = vmatmul.msk.f32.gmra.mxu0 %vm283_vm0, %v269_v10 }
  0x4e   : > { %1427 = vmatmul.msk.f32.gmra.mxu0 %vm283_vm0, %v270_v11 }
  0x56   : > { %1428 = vmatmul.msk.f32.gmra.mxu0 %vm283_vm0, %v271_v17 }
  0x5e   : > { %1429 = vmatmul.msk.f32.gmra.mxu0 %vm283_vm0, %v272_v19 }
  0x66   : > { %1430 = vmatmul.msk.f32.gmra.mxu0 %vm283_vm0, %v273_v20 }
  0x6e   : > { %1431 = vmatmul.msk.f32.gmra.mxu0 %vm283_vm0, %v274_v21  ;;  %vm777_vm0 = vcmp.eq.s32.totalorder %v1711_v16, %v775_v42 }
  0x79   : > { %v2050_v19 = vpop.permute.xlu2 %519 }
  0x84   : > { %v2002_v0 = vpop.permute.xlu1 %509 }
  0x8e   : > { %v2023_v9 = vpop.permute.xlu1 %514 }
  0x93   : > { %v1740_v23 = vpop.f32.mrf.mxu0 }
  0x94   : > { %1446 = vmatmul.msk.f32.vlgmr.msrb.gmra.mxu0 %vm390_vm5, %v1740_v23 }
  0x95   : > { %1564 = vmatpush.msk.msrb.mxu0 %vm1107_vm10, %v1621_v18  ;;  %vm1004_vm10 = vcmp.eq.s32.totalorder %v1711_v16, %v1002_v53 }
  0x97   : > { %1565 = vmatpush.msk.msrb.mxu0 %vm1106_vm11, %v1621_v18  ;;  %vm893_vm11 = vcmp.eq.s32.totalorder %v1707_v14, %v892_v52 }
  0x9b   : > { %v1751_v25 = vpop.f32.mrf.mxu0 }
  0x9c   : > { %1447 = vmatmul.msk.f32.gmra.mxu0 %vm390_vm5, %v1751_v25 }
  0xa3   : > { %v1764_v28 = vpop.f32.mrf.mxu0 }
  0xa4   : > { %1448 = vmatmul.msk.f32.vlgmr.msra.gmra.mxu2 %vm390_vm5, %v1764_v28  ;;  %1526 = vmatmul.msk.f32.vlgmr.msra.gmra.mxu0 %vm390_vm5, %v1740_v23 }
  0xa5   : > { %1504 = vmatpush.msk.msra.mxu2 %vm777_vm0, %v1621_v18  ;;  %vm1224_vm0 = vcmp.eq.s32.totalorder %v1711_v16, %v1222_v59 }
  0xa7   : > { %1505 = vmatpush.msk.msra.mxu2 %vm776_vm1, %v1621_v18  ;;  %vm1113_vm1 = vcmp.eq.s32.totalorder %v1707_v14, %v1112_v57 }
  0xab   : > { %v1773_v29 = vpop.f32.mrf.mxu0 }
  0xac   : > { %1449 = vmatmul.msk.f32.gmra.mxu2 %vm390_vm5, %v1773_v29  ;;  %1527 = vmatmul.msk.f32.gmra.mxu0 %vm390_vm5, %v1751_v25 }
  0xb3   : > { %v1788_v33 = vpop.f32.mrf.mxu0 }
  0xb4   : > { %1450 = vmatmul.msk.f32.gmra.mxu2 %vm390_vm5, %v1788_v33  ;;  %1528 = vmatmul.msk.f32.gmra.mxu0 %vm390_vm5, %v1764_v28 }
  0xbb   : > { %v1799_v35 = vpop.f32.mrf.mxu0 }
  0xbc   : > { %1451 = vmatmul.msk.f32.gmra.mxu2 %vm390_vm5, %v1799_v35  ;;  %1529 = vmatmul.msk.f32.gmra.mxu0 %vm390_vm5, %v1773_v29 }
  0xc3   : > { %v1811_v38 = vpop.f32.mrf.mxu0 }
  0xc4   : > { %1438 = vmatmul.msk.f32.vlgmr.msra.gmra.mxu1 %vm390_vm5, %v1811_v38  ;;  %1478 = vmatmul.msk.f32.vlgmr.msrb.gmra.mxu2 %vm390_vm5, %v1811_v38 }
  0xc5   : > { %1530 = vmatmul.msk.f32.gmra.mxu0 %vm390_vm5, %v1788_v33  ;;  %1496 = vmatpush.msk.msra.mxu1 %vm784_vm2, %v1621_v18  ;;  %vm539_vm2 = vcmp.eq.s32.totalorder %v1749_v24, %v1704_v12 }
  0xc6   : > { %1544 = vmatpush.msk.msrb.mxu2 %vm997_vm7, %v1621_v18  ;;  %v2007_v2 = vsel %vm539_vm2, 1, %v1622_v32  ;;  %v2067_v32 = vpop.permute.xlu2 %524 }
  0xc7   : > { %1497 = vmatpush.msk.msra.mxu1 %vm783_vm6, %v1621_v18  ;;  %v541_v5 = vperm.slane %v2007_v2, 0  ;;  %v651_v52 = vperm.slane %v2007_v2, 1 }
  0xc8   : > { %1545 = vmatpush.msk.msrb.mxu2 %vm996_vm8, %v1621_v18 }
  0xc9   : > { %vm2090_vm6 = vcmp.eq.s32.totalorder %v651_v52, 1 }
  0xcb   : > { %v1827_v41 = vpop.f32.mrf.mxu0 }
  0xcc   : > { %1439 = vmatmul.msk.f32.gmra.mxu1 %vm390_vm5, %v1827_v41  ;;  %1479 = vmatmul.msk.f32.gmra.mxu2 %vm390_vm5, %v1827_v41 }
  0xcd   : > { %1531 = vmatmul.msk.f32.gmra.mxu0 %vm390_vm5, %v1799_v35 }
  0xd3   : > { %v1842_v43 = vpop.f32.mrf.mxu0 }
  0xd4   : > { %1440 = vmatmul.msk.f32.gmra.mxu1 %vm390_vm5, %v1842_v43  ;;  %1480 = vmatmul.msk.f32.gmra.mxu2 %vm390_vm5, %v1842_v43 }
  0xd5   : > { %1566 = vmatmul.msk.f32.vlgmr.msrb.gmra.mxu0 %vm390_vm5, %v1740_v23 }
  0xdb   : > { %v1850_v44 = vpop.f32.mrf.mxu0 }
  0xdc   : > { %1441 = vmatmul.msk.f32.gmra.mxu1 %vm390_vm5, %v1850_v44  ;;  %1481 = vmatmul.msk.f32.gmra.mxu2 %vm390_vm5, %v1850_v44 }
  0xdd   : > { %1567 = vmatmul.msk.f32.gmra.mxu0 %vm390_vm5, %v1751_v25 }
  0xe3   : > { %v1862_v47 = vpop.f32.mrf.mxu0 }
  0xe4   : > { %1442 = vmatmul.msk.f32.vlgmr.msra.gmra.mxu3 %vm390_vm5, %v1862_v47  ;;  %1466 = vmatmul.msk.f32.vlgmr.msrb.gmra.mxu1 %vm390_vm5, %v1740_v23 }
  0xe5   : > { %1482 = vmatmul.msk.f32.gmra.mxu2 %vm390_vm5, %v1862_v47  ;;  %1568 = vmatmul.msk.f32.gmra.mxu0 %vm390_vm5, %v1764_v28 }
  0xe6   : > { %1484 = vmatpush.msk.msra.mxu3 %vm667_vm3, %v1621_v18  ;;  %1536 = vmatpush.msk.msrb.mxu1 %vm1004_vm10, %v1621_v18  ;;  %vm1223_vm3 = vcmp.eq.s32.totalorder %v1707_v14, %v1222_v59 }
  0xe8   : > { %1485 = vmatpush.msk.msra.mxu3 %vm666_vm4, %v1621_v18  ;;  %1537 = vmatpush.msk.msrb.mxu1 %vm1003_vm12, %v1621_v18  ;;  %vm2019_vm4 = vcmp.eq.s32.totalorder %v541_v5, 1 }
  0xeb   : > { %v1874_v48 = vpop.f32.mrf.mxu0 }
  0xec   : > { %1443 = vmatmul.msk.f32.gmra.mxu3 %vm390_vm5, %v1874_v48  ;;  %1467 = vmatmul.msk.f32.gmra.mxu1 %vm390_vm5, %v1751_v25 }
  0xed   : > { %1483 = vmatmul.msk.f32.gmra.mxu2 %vm390_vm5, %v1874_v48  ;;  %1569 = vmatmul.msk.f32.gmra.mxu0 %vm390_vm5, %v1773_v29 }
  0xf4   : > { %1458 = vmatmul.msk.f32.vlgmr.msrb.gmra.mxu3 %vm390_vm5, %v1811_v38  ;;  %1468 = vmatmul.msk.f32.gmra.mxu1 %vm390_vm5, %v1764_v28 }
  0xf5   : > { %1506 = vmatmul.msk.f32.vlgmr.msra.gmra.mxu2 %vm390_vm5, %v1740_v23  ;;  %1570 = vmatmul.msk.f32.gmra.mxu0 %vm390_vm5, %v1788_v33 }
  0xf6   : > { %1516 = vmatpush.msk.msrb.mxu3 %vm894_vm9, %v1621_v18  ;;  %1584 = vmatpush.msk.msra.mxu2 %vm1217_vm13, %v1621_v18 }
  0xf8   : > { %1517 = vmatpush.msk.msrb.mxu3 %vm893_vm11, %v1621_v18  ;;  %1585 = vmatpush.msk.msra.mxu2 %vm1216_vm14, %v1621_v18 }
  0xfc   : > { %1459 = vmatmul.msk.f32.gmra.mxu3 %vm390_vm5, %v1827_v41  ;;  %1469 = vmatmul.msk.f32.gmra.mxu1 %vm390_vm5, %v1773_v29 }
  0xfd   : > { %1507 = vmatmul.msk.f32.gmra.mxu2 %vm390_vm5, %v1751_v25  ;;  %1571 = vmatmul.msk.f32.gmra.mxu0 %vm390_vm5, %v1799_v35 }
 0x104   : > { %1460 = vmatmul.msk.f32.gmra.mxu3 %vm390_vm5, %v1842_v43  ;;  %1470 = vmatmul.msk.f32.gmra.mxu1 %vm390_vm5, %v1788_v33 }
 0x105   : > { %1508 = vmatmul.msk.f32.gmra.mxu2 %vm390_vm5, %v1764_v28 }
 0x10c   : > { %1461 = vmatmul.msk.f32.gmra.mxu3 %vm390_vm5, %v1850_v44  ;;  %1471 = vmatmul.msk.f32.gmra.mxu1 %vm390_vm5, %v1799_v35 }
 0x10d   : > { %1509 = vmatmul.msk.f32.gmra.mxu2 %vm390_vm5, %v1773_v29 }
 0x111   : > { %v479_v24 = vpop.f32.mrf.mxu0 }
 0x114   : > { %1462 = vmatmul.msk.f32.gmra.mxu3 %vm390_vm5, %v1862_v47  ;;  %1498 = vmatmul.msk.f32.vlgmr.msra.gmra.mxu1 %vm390_vm5, %v1811_v38 }
 0x115   : > { %1510 = vmatmul.msk.f32.gmra.mxu2 %vm390_vm5, %v1788_v33  ;;  %1576 = vmatpush.msk.msra.mxu1 %vm1224_vm0, %v1621_v18 }
 0x117   : > { %1577 = vmatpush.msk.msra.mxu1 %vm1223_vm3, %v1621_v18 }
 0x119   : > { %v482_v40 = vpop.f32.mrf.mxu0 }
 0x11c   : > { %1463 = vmatmul.msk.f32.gmra.mxu3 %vm390_vm5, %v1874_v48  ;;  %1499 = vmatmul.msk.f32.gmra.mxu1 %vm390_vm5, %v1827_v41 }
 0x11d   : > { %1511 = vmatmul.msk.f32.gmra.mxu2 %vm390_vm5, %v1799_v35 }
 0x124   : > { %1486 = vmatmul.msk.f32.vlgmr.msra.gmra.mxu3 %vm390_vm5, %v1740_v23  ;;  %1500 = vmatmul.msk.f32.gmra.mxu1 %vm390_vm5, %v1842_v43 }
 0x125   : > { %1546 = vmatmul.msk.f32.vlgmr.msrb.gmra.mxu2 %vm390_vm5, %v1740_v23  ;;  %1556 = vmatpush.msk.msra.mxu3 %vm1114_vm15, %v1621_v18 }
 0x127   : > { %v485_v54 = vpop.f32.mrf.mxu2  ;;  %1557 = vmatpush.msk.msra.mxu3 %vm1113_vm1, %v1621_v18 }
 0x12c   : > { %1487 = vmatmul.msk.f32.gmra.mxu3 %vm390_vm5, %v1751_v25  ;;  %1501 = vmatmul.msk.f32.gmra.mxu1 %vm390_vm5, %v1850_v44 }
 0x12d   : > { %1547 = vmatmul.msk.f32.gmra.mxu2 %vm390_vm5, %v1751_v25 }
 0x12f   : > { %v488_v55 = vpop.f32.mrf.mxu2 }
 0x134   : > { %1488 = vmatmul.msk.f32.gmra.mxu3 %vm390_vm5, %v1764_v28  ;;  %1502 = vmatmul.msk.f32.gmra.mxu1 %vm390_vm5, %v1862_v47 }
 0x135   : > { %1548 = vmatmul.msk.f32.gmra.mxu2 %vm390_vm5, %v1764_v28 }
 0x137   : > { %v491_v58 = vpop.f32.mrf.mxu2 }
 0x13c   : > { %1489 = vmatmul.msk.f32.gmra.mxu3 %vm390_vm5, %v1773_v29  ;;  %1503 = vmatmul.msk.f32.gmra.mxu1 %vm390_vm5, %v1874_v48 }
 0x13d   : > { %1549 = vmatmul.msk.f32.gmra.mxu2 %vm390_vm5, %v1773_v29 }
 0x13f   : > { %v494_v60 = vpop.f32.mrf.mxu2 }
 0x141   : > { %v426_v61 = vpop.f32.mrf.mxu1 }
 0x144   : > { %1490 = vmatmul.msk.f32.gmra.mxu3 %vm390_vm5, %v1788_v33  ;;  %1538 = vmatmul.msk.f32.vlgmr.msrb.gmra.mxu1 %vm390_vm5, %v1811_v38 }
 0x145   : > { %1550 = vmatmul.msk.f32.gmra.mxu2 %vm390_vm5, %v1788_v33 }
 0x147   : > { %v1990_v62 = vpop.f32.mrf.mxu2 }
 0x149   : > { %v429_v63 = vpop.f32.mrf.mxu1 }
 0x14a   : > { %v483_v42 = vadd.f32 %v482_v40, %v429_v63 }
 0x14c   : > { %1491 = vmatmul.msk.f32.gmra.mxu3 %vm390_vm5, %v1799_v35  ;;  %1539 = vmatmul.msk.f32.gmra.mxu1 %vm390_vm5, %v1827_v41 }
 0x14d   : > { %1551 = vmatmul.msk.f32.gmra.mxu2 %vm390_vm5, %v1799_v35 }
 0x14f   : > { %v2004_v1 = vpop.f32.mrf.mxu2 }
 0x151   : > { %v432_v3 = vpop.f32.mrf.mxu1 }
 0x152   : > { %v486_v4 = vadd.f32 %v485_v54, %v432_v3 }
 0x154   : > { %1518 = vmatmul.msk.f32.vlgmr.msrb.gmra.mxu3 %vm390_vm5, %v1811_v38  ;;  %1540 = vmatmul.msk.f32.gmra.mxu1 %vm390_vm5, %v1842_v43  ;;  %v529_v6 = vadd.f32 %v2002_v0, %v486_v4 }
 0x155   : > { %1586 = vmatmul.msk.f32.vlgmr.msra.gmra.mxu2 %vm390_vm5, %v1740_v23 }
 0x156   : > { %v535_v7 = vmax.f32 %v529_v6, 0.0 }
 0x157   : > { %v2029_v11 = vpop.f32.mrf.mxu2 }
 0x158   : > { %v2027_v10 = vsel %vm2019_vm4, -1e+30, %v535_v7 }
 0x159   : > { %v435_v12 = vpop.f32.mrf.mxu1 }
 0x15a   : > { %v489_v13 = vadd.f32 %v488_v55, %v435_v12 }
 0x15c   : > { %1519 = vmatmul.msk.f32.gmra.mxu3 %vm390_vm5, %v1827_v41  ;;  %1541 = vmatmul.msk.f32.gmra.mxu1 %vm390_vm5, %v1850_v44  ;;  %v530_v14 = vadd.f32 %v2023_v9, %v489_v13 }
 0x15d   : > { %1587 = vmatmul.msk.f32.gmra.mxu2 %vm390_vm5, %v1751_v25  ;;  %v2053_v25 = vpop.permute.xlu0 %499 }
 0x15e   : > { %v536_v15 = vmax.f32 %v530_v14, 0.0 }
 0x15f   : > { %v2042_v18 = vpop.f32.mrf.mxu2 }
 0x160   : > { %v2040_v16 = vsel %vm2019_vm4, -1e+30, %v536_v15 }
 0x161   : > { %v621_v17 = vpop.f32.mrf.mxu1  ;;  %v552_v40 = vmax.f32 %v2040_v16, -1e+30 }
 0x164   : > { %1520 = vmatmul.msk.f32.gmra.mxu3 %vm390_vm5, %v1842_v43  ;;  %1542 = vmatmul.msk.f32.gmra.mxu1 %vm390_vm5, %v1862_v47 }
 0x165   : > { %1588 = vmatmul.msk.f32.gmra.mxu2 %vm390_vm5, %v1764_v28  ;;  %v480_v28 = vadd.f32 %v479_v24, %v426_v61  ;;  %v2077_v45 = vpop.permute.xlu0 %504 }
 0x166   : > { %v528_v56 = vadd.f32 %v2077_v45, %v483_v42 }
 0x167   : > { %v438_v20 = vpop.f32.mrf.mxu3  ;;  %v527_v37 = vadd.f32 %v2053_v25, %v480_v28 }
 0x168   : > { %v492_v21 = vadd.f32 %v491_v58, %v438_v20  ;;  %v2059_v27 = vpop.f32.mrf.mxu2  ;;  %v534_v61 = vmax.f32 %v528_v56, 0.0 }
 0x169   : > { %v624_v22 = vpop.f32.mrf.mxu1  ;;  %v533_v46 = vmax.f32 %v527_v37, 0.0 }
 0x16a   : > { %v531_v23 = vadd.f32 %v2050_v19, %v492_v21  ;;  %v544_v7 = vsel %vm2019_vm4, -1e+30, %v534_v61 }
 0x16b   : > { %v543_v55 = vsel %vm2019_vm4, -1e+30, %v533_v46 }
 0x16c   : > { %1521 = vmatmul.msk.f32.gmra.mxu3 %vm390_vm5, %v1850_v44  ;;  %1543 = vmatmul.msk.f32.gmra.mxu1 %vm390_vm5, %v1874_v48  ;;  %v537_v26 = vmax.f32 %v531_v23, 0.0  ;;  %v549_v59 = vmax.f32 %v543_v55, -1e+30 }
 0x16d   : > { %1589 = vmatmul.msk.f32.gmra.mxu2 %vm390_vm5, %v1773_v29 }
 0x16e   : > { %v2065_v30 = vsel %vm2019_vm4, -1e+30, %v537_v26 }
 0x16f   : > { %v441_v31 = vpop.f32.mrf.mxu3 }
 0x170   : > { %v495_v34 = vadd.f32 %v494_v60, %v441_v31  ;;  %v2083_v50 = vpop.f32.mrf.mxu2 }
 0x171   : > { %v627_v36 = vpop.f32.mrf.mxu1 }
 0x172   : > { %v532_v39 = vadd.f32 %v2067_v32, %v495_v34 }
 0x174   : > { %1522 = vmatmul.msk.f32.gmra.mxu3 %vm390_vm5, %v1862_v47  ;;  %1578 = vmatmul.msk.f32.vlgmr.msra.gmra.mxu1 %vm390_vm5, %v1811_v38  ;;  %v538_v29 = vmax.f32 %v532_v39, 0.0 }
 0x175   : > { %1590 = vmatmul.msk.f32.gmra.mxu2 %vm390_vm5, %v1788_v33 }
 0x176   : > { %v2081_v49 = vsel %vm2019_vm4, -1e+30, %v538_v29 }
 0x177   : > { %v586_v51 = vpop.f32.mrf.mxu3 }
 0x178   : > { %v622_v53 = vadd.f32 %v621_v17, %v586_v51  ;;  %v841_v5 = vpop.f32.mrf.mxu2 }
 0x179   : > { %v630_v54 = vpop.f32.mrf.mxu1 }
 0x17a   : > { %v639_v33 = vadd.f32 %v622_v53, %v2053_v25 }
 0x17c   : > { %v645_v58 = vmax.f32 %v639_v33, 0.0  ;;  %1523 = vmatmul.msk.f32.gmra.mxu3 %vm390_vm5, %v1874_v48  ;;  %1579 = vmatmul.msk.f32.gmra.mxu1 %vm390_vm5, %v1827_v41 }
 0x17d   : > { %1591 = vmatmul.msk.f32.gmra.mxu2 %vm390_vm5, %v1799_v35  ;;  %v550_v35 = vmax.f32 %v544_v7, -1e+30 }
 0x17e   : > { %v653_v60 = vsel %vm2090_vm6, -1e+30, %v645_v58 }
 0x17f   : > { %v2102_v63 = vmax.f32 %v549_v59, %v653_v60  ;;  %v589_v3 = vpop.f32.mrf.mxu3  ;;  %v553_v59 = vmax.f32 %v2065_v30, -1e+30  ;;  %v554_v30 = vmax.f32 %v2081_v49, -1e+30 }
 0x180   : > { %v625_v4 = vadd.f32 %v624_v22, %v589_v3  ;;  %v844_v22 = vpop.f32.mrf.mxu2 }
 0x181   : > { %v633_v6 = vpop.f32.mrf.mxu1 }
 0x182   : > { %v640_v12 = vadd.f32 %v625_v4, %v2077_v45 }
 0x184   : > { %v646_v13 = vmax.f32 %v640_v12, 0.0  ;;  %1558 = vmatmul.msk.f32.vlgmr.msra.gmra.mxu3 %vm390_vm5, %v1811_v38  ;;  %1580 = vmatmul.msk.f32.gmra.mxu1 %vm390_vm5, %v1842_v43  ;;  %v551_v38 = vmax.f32 %v2027_v10, -1e+30 }
 0x186   : > { %v654_v14 = vsel %vm2090_vm6, -1e+30, %v646_v13 }
 0x187   : > { %v2113_v15 = vmax.f32 %v550_v35, %v654_v14  ;;  %v592_v17 = vpop.f32.mrf.mxu3 }
 0x188   : > { %v628_v20 = vadd.f32 %v627_v36, %v592_v17  ;;  %v871_v36 = vperm.slane %v2007_v2, 3  ;;  %v847_v10 = vpop.f32.mrf.mxu2 }
 0x189   : > { %v636_v21 = vpop.f32.mrf.mxu1 }
 0x18a   : > { %v641_v8 = vadd.f32 %v628_v20, %v2002_v0  ;;  %vm2133_vm7 = vcmp.eq.s32.totalorder %v871_v36, 1 }
 0x18c   : > { %v647_v23 = vmax.f32 %v641_v8, 0.0  ;;  %1559 = vmatmul.msk.f32.gmra.mxu3 %vm390_vm5, %v1827_v41  ;;  %1581 = vmatmul.msk.f32.gmra.mxu1 %vm390_vm5, %v1850_v44 }
 0x18e   : > { %v655_v24 = vsel %vm2090_vm6, -1e+30, %v647_v23 }
 0x18f   : > { %v2123_v26 = vmax.f32 %v551_v38, %v655_v24  ;;  %v595_v28 = vpop.f32.mrf.mxu3 }
 0x190   : > { %v631_v31 = vadd.f32 %v630_v54, %v595_v28  ;;  %v850_v3 = vpop.f32.mrf.mxu2 }
 0x191   : > { %v806_v34 = vpop.f32.mrf.mxu1 }
 0x192   : > { %v642_v37 = vadd.f32 %v631_v31, %v2023_v9  ;;  %v842_v39 = vadd.f32 %v841_v5, %v806_v34 }
 0x194   : > { %v648_v29 = vmax.f32 %v642_v37, 0.0  ;;  %v859_v41 = vadd.f32 %v842_v39, %v2053_v25  ;;  %1560 = vmatmul.msk.f32.gmra.mxu3 %vm390_vm5, %v1842_v43  ;;  %1582 = vmatmul.msk.f32.gmra.mxu1 %vm390_vm5, %v1862_v47 }
 0x196   : > { %v656_v46 = vsel %vm2090_vm6, -1e+30, %v648_v29  ;;  %v865_v51 = vmax.f32 %v859_v41, 0.0 }
 0x197   : > { %v2139_v52 = vmax.f32 %v552_v40, %v656_v46  ;;  %v598_v53 = vpop.f32.mrf.mxu3 }
 0x198   : > { %v873_v43 = vsel %vm2133_vm7, -1e+30, %v865_v51  ;;  %v634_v54 = vadd.f32 %v633_v6, %v598_v53  ;;  %v853_v24 = vpop.f32.mrf.mxu2 }
 0x199   : > { %v809_v55 = vpop.f32.mrf.mxu1 }
 0x19a   : > { %v643_v33 = vadd.f32 %v634_v54, %v2050_v19  ;;  %v845_v56 = vadd.f32 %v844_v22, %v809_v55 }
 0x19c   : > { %v649_v16 = vmax.f32 %v643_v33, 0.0  ;;  %v860_v58 = vadd.f32 %v845_v56, %v2077_v45  ;;  %1561 = vmatmul.msk.f32.gmra.mxu3 %vm390_vm5, %v1850_v44  ;;  %1583 = vmatmul.msk.f32.gmra.mxu1 %vm390_vm5, %v1874_v48 }
 0x19e   : > { %v657_v60 = vsel %vm2090_vm6, -1e+30, %v649_v16  ;;  %v866_v61 = vmax.f32 %v860_v58, 0.0 }
 0x19f   : > { %v2152_v4 = vmax.f32 %v553_v59, %v657_v60  ;;  %v601_v5 = vpop.f32.mrf.mxu3 }
 0x1a0   : > { %v874_v6 = vsel %vm2133_vm7, -1e+30, %v866_v61  ;;  %v637_v7 = vadd.f32 %v636_v21, %v601_v5  ;;  %v761_v21 = vperm.slane %v2007_v2, 2  ;;  %v856_v53 = vpop.f32.mrf.mxu2 }
 0x1a1   : > { %v812_v12 = vpop.f32.mrf.mxu1 }
 0x1a2   : > { %v644_v44 = vadd.f32 %v637_v7, %v2067_v32  ;;  %v848_v13 = vadd.f32 %v847_v10, %v812_v12  ;;  %vm2170_vm8 = vcmp.eq.s32.totalorder %v761_v21, 1 }
 0x1a4   : > { %v650_v35 = vmax.f32 %v644_v44, 0.0  ;;  %v861_v14 = vadd.f32 %v848_v13, %v2002_v0  ;;  %1562 = vmatmul.msk.f32.gmra.mxu3 %vm390_vm5, %v1862_v47  ;;  %v951_v13 = vpop.f32.mrf.mxu0 }
 0x1a6   : > { %v658_v17 = vsel %vm2090_vm6, -1e+30, %v650_v35  ;;  %v867_v20 = vmax.f32 %v861_v14, 0.0 }
 0x1a7   : > { %v2163_v8 = vmax.f32 %v554_v30, %v658_v17  ;;  %v731_v22 = vpop.f32.mrf.mxu3 }
 0x1a8   : > { %v875_v23 = vsel %vm2133_vm7, -1e+30, %v867_v20  ;;  %v732_v38 = vadd.f32 %v731_v22, %v1990_v62  ;;  %v1061_v5 = vpop.f32.mrf.mxu2 }
 0x1a9   : > { %v815_v28 = vpop.f32.mrf.mxu1 }
 0x1aa   : > { %v749_v47 = vadd.f32 %v732_v38, %v2053_v25  ;;  %v851_v31 = vadd.f32 %v850_v3, %v815_v28 }
 0x1ac   : > { %v755_v57 = vmax.f32 %v749_v47, 0.0  ;;  %v862_v34 = vadd.f32 %v851_v31, %v2023_v9  ;;  %1563 = vmatmul.msk.f32.gmra.mxu3 %vm390_vm5, %v1874_v48  ;;  %v954_v28 = vpop.f32.mrf.mxu0 }
 0x1ae   : > { %v763_v36 = vsel %vm2170_vm8, -1e+30, %v755_v57  ;;  %v868_v37 = vmax.f32 %v862_v34, 0.0 }
 0x1af   : > { %v769_v62 = vmax.f32 %v2102_v63, %v763_v36  ;;  %v734_v39 = vpop.f32.mrf.mxu3 }
 0x1b0   : > { %v876_v29 = vsel %vm2133_vm7, -1e+30, %v868_v37  ;;  %v735_v41 = vadd.f32 %v734_v39, %v2004_v1  ;;  %v1064_v22 = vpop.f32.mrf.mxu2 }
 0x1b1   : > { %v818_v10 = vpop.f32.mrf.mxu1  ;;  %v2183_v40 = vmax.f32 %v769_v62, %v873_v43 }
 0x1b2   : > { %v750_v46 = vadd.f32 %v735_v41, %v2077_v45  ;;  %v854_v51 = vadd.f32 %v853_v24, %v818_v10 }
 0x1b4   : > { %v756_v48 = vmax.f32 %v750_v46, 0.0  ;;  %v863_v54 = vadd.f32 %v854_v51, %v2050_v19 }
 0x1b6   : > { %v764_v55 = vsel %vm2170_vm8, -1e+30, %v756_v48  ;;  %v869_v63 = vmax.f32 %v863_v54, 0.0 }
 0x1b7   : > { %v770_v33 = vmax.f32 %v2113_v15, %v764_v55  ;;  %v737_v56 = vpop.f32.mrf.mxu3 }
 0x1b8   : > { %v877_v1 = vsel %vm2133_vm7, -1e+30, %v869_v63  ;;  %v738_v43 = vadd.f32 %v737_v56, %v2029_v11  ;;  %v1067_v36 = vpop.f32.mrf.mxu2 }
 0x1b9   : > { %v821_v16 = vpop.f32.mrf.mxu1  ;;  %v2193_v58 = vmax.f32 %v770_v33, %v874_v6 }
 0x1ba   : > { %v751_v59 = vadd.f32 %v738_v43, %v2002_v0  ;;  %v857_v60 = vadd.f32 %v856_v53, %v821_v16  ;;  %v1091_v53 = vperm.slane %v2007_v2, 5 }
 0x1bc   : > { %v757_v61 = vmax.f32 %v751_v59, 0.0  ;;  %v864_v3 = vadd.f32 %v857_v60, %v2067_v32  ;;  %vm2233_vm10 = vcmp.eq.s32.totalorder %v1091_v53, 1 }
 0x1be   : > { %v765_v7 = vsel %vm2170_vm8, -1e+30, %v757_v61  ;;  %v870_v15 = vmax.f32 %v864_v3, 0.0 }
 0x1bf   : > { %v771_v12 = vmax.f32 %v2123_v26, %v765_v7  ;;  %v740_v44 = vpop.f32.mrf.mxu3 }
 0x1c0   : > { %v878_v11 = vsel %vm2133_vm7, -1e+30, %v870_v15  ;;  %v741_v6 = vadd.f32 %v740_v44, %v2042_v18  ;;  %v1070_v63 = vpop.f32.mrf.mxu2 }
 0x1c1   : > { %v1026_v35 = vpop.f32.mrf.mxu1  ;;  %v2203_v14 = vmax.f32 %v771_v12, %v875_v23 }
 0x1c2   : > { %v752_v30 = vadd.f32 %v741_v6, %v2023_v9  ;;  %v1062_v62 = vadd.f32 %v1061_v5, %v1026_v35 }
 0x1c4   : > { %v758_v17 = vmax.f32 %v752_v30, 0.0  ;;  %v1079_v51 = vadd.f32 %v1062_v62, %v2053_v25 }
 0x1c6   : > { %v766_v20 = vsel %vm2170_vm8, -1e+30, %v758_v17  ;;  %v1085_v49 = vmax.f32 %v1079_v51, 0.0 }
 0x1c7   : > { %v772_v21 = vmax.f32 %v2139_v52, %v766_v20  ;;  %v743_v26 = vpop.f32.mrf.mxu3 }
 0x1c8   : > { %v744_v38 = vadd.f32 %v743_v26, %v2059_v27  ;;  %v1093_v61 = vsel %vm2233_vm10, -1e+30, %v1085_v49 }
 0x1c9   : > { %v1029_v42 = vpop.f32.mrf.mxu1  ;;  %v2210_v24 = vmax.f32 %v772_v21, %v876_v29  ;;  %v957_v29 = vpop.f32.mrf.mxu0 }
 0x1ca   : > { %v753_v18 = vadd.f32 %v744_v38, %v2050_v19 }
 0x1cc   : > { %v759_v23 = vmax.f32 %v753_v18, 0.0 }
 0x1ce   : > { %v767_v47 = vsel %vm2170_vm8, -1e+30, %v759_v23 }
 0x1cf   : > { %v773_v31 = vmax.f32 %v2152_v4, %v767_v47  ;;  %v746_v57 = vpop.f32.mrf.mxu3  ;;  %v981_v4 = vperm.slane %v2007_v2, 4 }
 0x1d0   : > { %v747_v34 = vadd.f32 %v746_v57, %v2083_v50 }
 0x1d1   : > { %v1032_v52 = vpop.f32.mrf.mxu1  ;;  %v2217_v37 = vmax.f32 %v773_v31, %v877_v1  ;;  %vm2229_vm9 = vcmp.eq.s32.totalorder %v981_v4, 1  ;;  %v960_v16 = vpop.f32.mrf.mxu0 }
 0x1d2   : > { %v754_v27 = vadd.f32 %v747_v34, %v2067_v32 }
 0x1d4   : > { %v760_v39 = vmax.f32 %v754_v27, 0.0 }
 0x1d6   : > { %v768_v41 = vsel %vm2170_vm8, -1e+30, %v760_v39 }
 0x1d7   : > { %v774_v10 = vmax.f32 %v2163_v8, %v768_v41  ;;  %v916_v46 = vpop.f32.mrf.mxu3  ;;  %v1065_v8 = vadd.f32 %v1064_v22, %v1029_v42 }
 0x1d8   : > { %v952_v50 = vadd.f32 %v951_v13, %v916_v46  ;;  %v1073_v13 = vpop.f32.mrf.mxu2 }
 0x1d9   : > { %v1035_v48 = vpop.f32.mrf.mxu1  ;;  %v2226_v54 = vmax.f32 %v774_v10, %v878_v11  ;;  %v1080_v3 = vadd.f32 %v1065_v8, %v2077_v45  ;;  %v1068_v11 = vadd.f32 %v1067_v36, %v1032_v52  ;;  %v963_v21 = vpop.f32.mrf.mxu0 }
 0x1da   : > { %v969_v55 = vadd.f32 %v952_v50, %v2053_v25  ;;  %v1071_v18 = vadd.f32 %v1070_v63, %v1035_v48 }
 0x1db   : > { %v1086_v44 = vmax.f32 %v1080_v3, 0.0  ;;  %v1081_v20 = vadd.f32 %v1068_v11, %v2002_v0 }
 0x1dc   : > { %v975_v56 = vmax.f32 %v969_v55, 0.0  ;;  %v1082_v36 = vadd.f32 %v1071_v18, %v2023_v9 }
 0x1dd   : > { %v1094_v17 = vsel %vm2233_vm10, -1e+30, %v1086_v44  ;;  %v1087_v42 = vmax.f32 %v1081_v20, 0.0  ;;  %v1201_v20 = vperm.slane %v2007_v2, 6 }
 0x1de   : > { %v983_v43 = vsel %vm2229_vm9, -1e+30, %v975_v56 }
 0x1df   : > { %v989_v59 = vmax.f32 %v2183_v40, %v983_v43  ;;  %v919_v60 = vpop.f32.mrf.mxu3  ;;  %v1095_v34 = vsel %vm2233_vm10, -1e+30, %v1087_v42  ;;  %v1311_v42 = vperm.slane %v2007_v2, 7  ;;  %vm2293_vm11 = vcmp.eq.s32.totalorder %v1201_v20, 1 }
 0x1e0   : > { %v955_v5 = vadd.f32 %v954_v28, %v919_v60 }
 0x1e1   : > { %v2243_v7 = vmax.f32 %v989_v59, %v1093_v61  ;;  %v1038_v12 = vpop.f32.mrf.mxu1  ;;  %v966_v39 = vpop.f32.mrf.mxu0  ;;  %vm2298_vm12 = vcmp.eq.s32.totalorder %v1311_v42, 1 }
 0x1e2   : > { %v970_v15 = vadd.f32 %v955_v5, %v2077_v45  ;;  %v1074_v41 = vadd.f32 %v1073_v13, %v1038_v12 }
 0x1e4   : > { %v976_v6 = vmax.f32 %v970_v15, 0.0  ;;  %v1083_v53 = vadd.f32 %v1074_v41, %v2050_v19 }
 0x1e6   : > { %v984_v35 = vsel %vm2229_vm9, -1e+30, %v976_v6  ;;  %v1089_v8 = vmax.f32 %v1083_v53, 0.0 }
 0x1e7   : > { %v990_v40 = vmax.f32 %v2193_v58, %v984_v35  ;;  %v922_v30 = vpop.f32.mrf.mxu3  ;;  %v1076_v58 = vpop.f32.mrf.mxu2 }
 0x1e8   : > { %v958_v22 = vadd.f32 %v957_v29, %v922_v30  ;;  %v1088_v29 = vmax.f32 %v1082_v36, 0.0  ;;  %v1097_v61 = vsel %vm2233_vm10, -1e+30, %v1089_v8 }
 0x1e9   : > { %v2252_v26 = vmax.f32 %v990_v40, %v1094_v17  ;;  %v1041_v23 = vpop.f32.mrf.mxu1 }
 0x1ea   : > { %v971_v38 = vadd.f32 %v958_v22, %v2002_v0  ;;  %v1096_v50 = vsel %vm2233_vm10, -1e+30, %v1088_v29  ;;  %v1077_v56 = vadd.f32 %v1076_v58, %v1041_v23 }
 0x1ec   : > { %v977_v28 = vmax.f32 %v971_v38, 0.0  ;;  %v1084_v3 = vadd.f32 %v1077_v56, %v2067_v32 }
 0x1ee   : > { %v985_v47 = vsel %vm2229_vm9, -1e+30, %v977_v28  ;;  %v1090_v6 = vmax.f32 %v1084_v3, 0.0 }
 0x1ef   : > { %v991_v31 = vmax.f32 %v2203_v14, %v985_v47  ;;  %v925_v57 = vpop.f32.mrf.mxu3  ;;  %v1281_v55 = vpop.f32.mrf.mxu2 }
 0x1f0   : > { %v961_v52 = vadd.f32 %v960_v16, %v925_v57  ;;  %v1171_v16 = vpop.f32.mrf.mxu0  ;;  %v1098_v22 = vsel %vm2233_vm10, -1e+30, %v1090_v6 }
 0x1f1   : > { %v2261_v27 = vmax.f32 %v991_v31, %v1095_v34  ;;  %v1246_v4 = vpop.f32.mrf.mxu1 }
 0x1f2   : > { %v972_v62 = vadd.f32 %v961_v52, %v2023_v9  ;;  %v1282_v13 = vadd.f32 %v1281_v55, %v1246_v4 }
 0x1f4   : > { %v978_v10 = vmax.f32 %v972_v62, 0.0 }
 0x1f6   : > { %v986_v46 = vsel %vm2229_vm9, -1e+30, %v978_v10 }
 0x1f7   : > { %v992_v14 = vmax.f32 %v2210_v24, %v986_v46  ;;  %v928_v51 = vpop.f32.mrf.mxu3  ;;  %v1284_v11 = vpop.f32.mrf.mxu2 }
 0x1f8   : > { %v964_v48 = vadd.f32 %v963_v21, %v928_v51  ;;  %v1174_v40 = vpop.f32.mrf.mxu0  ;;  %v1299_v21 = vadd.f32 %v1282_v13, %v2053_v25 }
 0x1f9   : > { %v2270_v63 = vmax.f32 %v992_v14, %v1096_v50  ;;  %v1249_v15 = vpop.f32.mrf.mxu1 }
 0x1fa   : > { %v973_v49 = vadd.f32 %v964_v48, %v2050_v19  ;;  %v1285_v47 = vadd.f32 %v1284_v11, %v1249_v15 }
 0x1fc   : > { %v979_v43 = vmax.f32 %v973_v49, 0.0  ;;  %v1300_v36 = vadd.f32 %v1285_v47, %v2077_v45 }
 0x1fe   : > { %v987_v24 = vsel %vm2229_vm9, -1e+30, %v979_v43 }
 0x1ff   : > { %v993_v59 = vmax.f32 %v2217_v37, %v987_v24  ;;  %v931_v60 = vpop.f32.mrf.mxu3  ;;  %v1287_v1 = vpop.f32.mrf.mxu2 }
 0x200   : > { %v967_v5 = vadd.f32 %v966_v39, %v931_v60  ;;  %v1177_v62 = vpop.f32.mrf.mxu0 }
 0x201   : > { %v2279_v12 = vmax.f32 %v993_v59, %v1097_v61  ;;  %v1252_v33 = vpop.f32.mrf.mxu1 }
 0x202   : > { %v974_v44 = vadd.f32 %v967_v5, %v2067_v32  ;;  %v1288_v41 = vadd.f32 %v1287_v1, %v1252_v33 }
 0x204   : > { %v980_v35 = vmax.f32 %v974_v44, 0.0  ;;  %v1301_v48 = vadd.f32 %v1288_v41, %v2002_v0 }
 0x206   : > { %v988_v37 = vsel %vm2229_vm9, -1e+30, %v980_v35  ;;  %v1307_v56 = vmax.f32 %v1301_v48, 0.0 }
 0x207   : > { %v994_v30 = vmax.f32 %v2226_v54, %v988_v37  ;;  %v1136_v17 = vpop.f32.mrf.mxu3  ;;  %v1305_v54 = vmax.f32 %v1299_v21, 0.0  ;;  %v1290_v4 = vpop.f32.mrf.mxu2 }
 0x208   : > { %v1172_v38 = vadd.f32 %v1171_v16, %v1136_v17  ;;  %v1180_v8 = vpop.f32.mrf.mxu0  ;;  %v1315_v61 = vsel %vm2298_vm12, -1e+30, %v1307_v56 }
 0x209   : > { %v2290_v18 = vmax.f32 %v994_v30, %v1098_v22  ;;  %v1313_v34 = vsel %vm2298_vm12, -1e+30, %v1305_v54  ;;  %v1255_v46 = vpop.f32.mrf.mxu1 }
 0x20a   : > { %v1189_v28 = vadd.f32 %v1172_v38, %v2053_v25  ;;  %v1291_v43 = vadd.f32 %v1290_v4, %v1255_v46 }
 0x20c   : > { %v1195_v58 = vmax.f32 %v1189_v28, 0.0  ;;  %v1302_v3 = vadd.f32 %v1291_v43, %v2023_v9 }
 0x20e   : > { %v1203_v2 = vsel %vm2293_vm11, -1e+30, %v1195_v58  ;;  %v1308_v11 = vmax.f32 %v1302_v3, 0.0 }
 0x20f   : > { %v1209_v57 = vmax.f32 %v2243_v7, %v1203_v2  ;;  %v1139_v25 = vpop.f32.mrf.mxu3  ;;  %v1306_v7 = vmax.f32 %v1300_v36, 0.0  ;;  %v1293_v5 = vpop.f32.mrf.mxu2 }
 0x210   : > { %v1175_v52 = vadd.f32 %v1174_v40, %v1139_v25  ;;  %v1183_v35 = vpop.f32.mrf.mxu0  ;;  %v1316_v30 = vsel %vm2298_vm12, -1e+30, %v1308_v11 }
 0x211   : > { %v1319_v39 = vmax.f32 %v1209_v57, %v1313_v34  ;;  %v1314_v53 = vsel %vm2298_vm12, -1e+30, %v1306_v7  ;;  %v1258_v24 = vpop.f32.mrf.mxu1 }
 0x212   : > { %v1190_v29 = vadd.f32 %v1175_v52, %v2077_v45  ;;  %v1294_v6 = vadd.f32 %v1293_v5, %v1258_v24 }
 0x213   : > { %1325 = vst.msk [vmem:[%s2308_s24] sm:$0xff] %vm390_vm5, %v1319_v39 }
 0x214   : > { %v1196_v10 = vmax.f32 %v1190_v29, 0.0  ;;  %v1303_v17 = vadd.f32 %v1294_v6, %v2050_v19 }
 0x216   : > { %v1204_v14 = vsel %vm2293_vm11, -1e+30, %v1196_v10  ;;  %v1309_v42 = vmax.f32 %v1303_v17, 0.0 }
 0x217   : > { %v1210_v51 = vmax.f32 %v2252_v26, %v1204_v14  ;;  %v1142_v50 = vpop.f32.mrf.mxu3  ;;  %v1296_v38 = vpop.f32.mrf.mxu2 }
 0x218   : > { %v1178_v45 = vadd.f32 %v1177_v62, %v1142_v50  ;;  %v1186_v54 = vpop.f32.mrf.mxu0  ;;  %v1317_v1 = vsel %vm2298_vm12, -1e+30, %v1309_v42 }
 0x219   : > { %v1320_v55 = vmax.f32 %v1210_v51, %v1314_v53 }
 0x21a   : > { %v1191_v49 = vadd.f32 %v1178_v45, %v2002_v0 }
 0x21b   : > { %1326 = vst.msk [vmem:[%s2308_s24 + $0x8] sm:$0xff] %vm390_vm5, %v1320_v55 }
 0x21c   : > { %v1197_v16 = vmax.f32 %v1191_v49, 0.0 }
 0x21e   : > { %v1205_v26 = vsel %vm2293_vm11, -1e+30, %v1197_v16 }
 0x21f   : > { %v1211_v59 = vmax.f32 %v2261_v27, %v1205_v26  ;;  %v1145_v60 = vpop.f32.mrf.mxu3 }
 0x220   : > { %v1181_v0 = vadd.f32 %v1180_v8, %v1145_v60 }
 0x221   : > { %v1321_v15 = vmax.f32 %v1211_v59, %v1315_v61 }
 0x222   : > { %v1192_v44 = vadd.f32 %v1181_v0, %v2023_v9  ;;  %v1261_v9 = vpop.f32.mrf.mxu1 }
 0x223   : > { %1327 = vst.msk [vmem:[%s2308_s24 + $0x10] sm:$0xff] %vm390_vm5, %v1321_v15  ;;  %v1297_v28 = vadd.f32 %v1296_v38, %v1261_v9 }
 0x224   : > { %v1198_v13 = vmax.f32 %v1192_v44, 0.0 }
 0x225   : > { %v1304_v2 = vadd.f32 %v1297_v28, %v2067_v32 }
 0x226   : > { %v1206_v27 = vsel %vm2293_vm11, -1e+30, %v1198_v13 }
 0x227   : > { %v1212_v37 = vmax.f32 %v2270_v63, %v1206_v27  ;;  %v1148_v40 = vpop.f32.mrf.mxu3  ;;  %v1310_v34 = vmax.f32 %v1304_v2, 0.0 }
 0x228   : > { %v1184_v20 = vadd.f32 %v1183_v35, %v1148_v40 }
 0x229   : > { %v1322_v22 = vmax.f32 %v1212_v37, %v1316_v30 }
 0x22a   : > { %v1193_v21 = vadd.f32 %v1184_v20, %v2050_v19 }
 0x22b   : > { %1328 = vst.msk [vmem:[%s2308_s24 + $0x18] sm:$0xff] %vm390_vm5, %v1322_v22 }
 0x22c   : > { %v1199_v33 = vmax.f32 %v1193_v21, 0.0 }
 0x22e   : > { %v1207_v63 = vsel %vm2293_vm11, -1e+30, %v1199_v33 }
 0x22f   : > { %v1213_v47 = vmax.f32 %v2279_v12, %v1207_v63  ;;  %v1151_v58 = vpop.f32.mrf.mxu3  ;;  %v1318_v12 = vsel %vm2298_vm12, -1e+30, %v1310_v34 }
 0x230   : > { %v1187_v19 = vadd.f32 %v1186_v54, %v1151_v58 }
 0x231   : > { %v1323_v57 = vmax.f32 %v1213_v47, %v1317_v1 }
 0x232   : > { %v1194_v25 = vadd.f32 %v1187_v19, %v2067_v32 }
 0x233   : > { %1329 = vst.msk [vmem:[%s2308_s24 + $0x20] sm:$0xff] %vm390_vm5, %v1323_v57 }
 0x234   : > { %v1200_v36 = vmax.f32 %v1194_v25, 0.0 }
 0x236   : > { %v1208_v52 = vsel %vm2293_vm11, -1e+30, %v1200_v36 }
 0x237   : > { %v1214_v62 = vmax.f32 %v2290_v18, %v1208_v52 }
 0x239   : > { %v1324_v39 = vmax.f32 %v1214_v62, %v1318_v12 }
 0x23b   : > { %1330 = vst.msk [vmem:[%s2308_s24 + $0x28] sm:$0xff] %vm390_vm5, %v1324_v39 }
 0x23c PF: > { %s15_s18 = sadd.s32 1, %s1619_s18  }
 0x23d   : > { %p12_p4 = scmp.ge.s32.totalorder %s15_s18, 4  }
 0x23f   :  { %14 = sbr.rel (!%p12_p4) target bundleno = 1 (0x1), region = 76 }

</bundles_post_ra>
